<compile_context>
chip_gen: v7x
topology: tpu7x:2x2x1
jax: 0.10.0
libtpu: 0.0.40
codegen_flags: <defaults>
</compile_context>

<pallas_src>
import jax
import jax.numpy as jnp
from jax.experimental import pallas as pl
from jax.experimental.pallas import tpu as pltpu

DROPOUT_P = 0.1
INV_SCALE_FACTOR = 1.0 / 8.0

# Constant q/k/v baked into the PyTorch module.
_Q = jnp.array([[3.0, 4.0], [1.0, 2.0]], dtype=jnp.float32)
_K = jnp.array([[1.0, 2.0], [3.0, 4.0]], dtype=jnp.float32)
_V = jnp.array([[10.0, 30.0], [20.0, 40.0]], dtype=jnp.float32)


def _dropout_matmul_kernel(sm_ref, v_ref, u_ref, o_ref):
    """Apply dropout to the precomputed softmax probabilities and do the final
    2x2 contraction on the VPU (broadcast mul-adds; MXU is overkill here)."""
    sm = sm_ref[...]          # (2, 2) softmax(8 * q @ k^T), trace-time constant
    v = v_ref[...]            # (2, 2) value matrix, trace-time constant
    u = u_ref[...]            # (2, 2) uniforms in [0, 1)

    # dropout: keep with prob (1 - p), scale kept values by 1/(1 - p).
    # Fold the scale into the mask so there is a single VPU multiply.
    keep_scaled = jnp.where(
        u >= DROPOUT_P,
        jnp.float32(1.0 / (1.0 - DROPOUT_P)),
        jnp.float32(0.0),
    )
    dropped = sm * keep_scaled

    # output = dropped @ v with K == 2, expressed as VPU broadcast mul-adds.
    o_ref[...] = dropped[:, 0:1] * v[0:1, :] + dropped[:, 1:2] * v[1:2, :]


def model_forward(x, seed=0):
    """Reproduces Model.forward(x). `x` is accepted but unused, exactly as in
    the PyTorch module (its forward only consumes the constant q/k/v)."""
    del x  # unused by the reference forward pass

    # All of q@k^T, the /inv_scale_factor (== *8) and the softmax are functions
    # of literals -> hoist to trace time; only dropout + contraction stay in
    # the kernel.
    scaled = jnp.dot(_Q, _K.T) * (1.0 / INV_SCALE_FACTOR)
    sm = jax.nn.softmax(scaled, axis=-1)

    # Dropout uniforms from the stock JAX PRNG (statistically equivalent to
    # torch dropout; not bit-identical to PyTorch's RNG stream).
    u = jax.random.uniform(jax.random.PRNGKey(seed), (2, 2), dtype=jnp.float32)

    vmem_spec = pl.BlockSpec(memory_space=pltpu.MemorySpace.VMEM)
    return pl.pallas_call(
        _dropout_matmul_kernel,
        out_shape=jax.ShapeDtypeStruct((2, 2), jnp.float32),
        in_specs=[vmem_spec, vmem_spec, vmem_spec],
        out_specs=vmem_spec,
    )(sm, _V, u)


if __name__ == "__main__":
    key = jax.random.PRNGKey(0)
    # Module input (NCHW); small deterministic shape — unused by the forward.
    x = jax.random.normal(key, (2, 4, 16, 16), dtype=jnp.float32)

    out = jax.block_until_ready(model_forward(x, seed=0))

    assert out.shape == (2, 2) and out.dtype == jnp.float32
    assert bool(jnp.all(jnp.isfinite(out)))
    print("KERNEL_OK")
</pallas_src>

<mosaic_0001>
module attributes {stable_mosaic.version = 11 : i64} {
  func.func @_dropout_matmul_kernel(%arg0: memref<2x2xf32, #tpu.memory_space<vmem>>, %arg1: memref<2x2xf32, #tpu.memory_space<vmem>>, %arg2: memref<2x2xf32, #tpu.memory_space<vmem>>, %arg3: memref<2x2xf32, #tpu.memory_space<vmem>>) attributes {dimension_semantics = [], scalar_prefetch = 0 : i64, scratch_operands = 0 : i64, tpu.core_type = #tpu.core_type<tc>} {
    %c0 = arith.constant 0 : index
    %c0_0 = arith.constant 0 : index
    %0 = vector.load %arg0[%c0, %c0_0] : memref<2x2xf32, #tpu.memory_space<vmem>>, vector<2x2xf32>
    %c0_1 = arith.constant 0 : index
    %c0_2 = arith.constant 0 : index
    %1 = vector.load %arg1[%c0_1, %c0_2] : memref<2x2xf32, #tpu.memory_space<vmem>>, vector<2x2xf32>
    %c0_3 = arith.constant 0 : index
    %c0_4 = arith.constant 0 : index
    %2 = vector.load %arg2[%c0_3, %c0_4] : memref<2x2xf32, #tpu.memory_space<vmem>>, vector<2x2xf32>
    %cst = arith.constant 1.000000e-01 : f32
    %3 = vector.broadcast %cst : f32 to vector<2x2xf32>
    %4 = arith.cmpf oge, %2, %3 : vector<2x2xf32>
    %cst_5 = arith.constant 1.11111116 : f32
    %cst_6 = arith.constant 0.000000e+00 : f32
    %5 = vector.broadcast %cst_5 : f32 to vector<2x2xf32>
    %6 = vector.broadcast %cst_6 : f32 to vector<2x2xf32>
    %7 = arith.select %4, %5, %6 : vector<2x2xi1>, vector<2x2xf32>
    %8 = arith.mulf %0, %7 : vector<2x2xf32>
    %9 = vector.extract_strided_slice %8 {offsets = [0, 0], sizes = [2, 1], strides = [1, 1]} : vector<2x2xf32> to vector<2x1xf32>
    %10 = vector.extract_strided_slice %1 {offsets = [0, 0], sizes = [1, 2], strides = [1, 1]} : vector<2x2xf32> to vector<1x2xf32>
    %11 = vector.broadcast %9 : vector<2x1xf32> to vector<2x2xf32>
    %12 = vector.broadcast %10 : vector<1x2xf32> to vector<2x2xf32>
    %13 = arith.mulf %11, %12 : vector<2x2xf32>
    %14 = vector.extract_strided_slice %8 {offsets = [0, 1], sizes = [2, 1], strides = [1, 1]} : vector<2x2xf32> to vector<2x1xf32>
    %15 = vector.extract_strided_slice %1 {offsets = [1, 0], sizes = [1, 2], strides = [1, 1]} : vector<2x2xf32> to vector<1x2xf32>
    %16 = vector.broadcast %14 : vector<2x1xf32> to vector<2x2xf32>
    %17 = vector.broadcast %15 : vector<1x2xf32> to vector<2x2xf32>
    %18 = arith.mulf %16, %17 : vector<2x2xf32>
    %19 = arith.addf %13, %18 : vector<2x2xf32>
    %c0_7 = arith.constant 0 : index
    %c0_8 = arith.constant 0 : index
    %20 = vector.load %arg3[%c0_7, %c0_8] : memref<2x2xf32, #tpu.memory_space<vmem>>, vector<2x2xf32>
    tpu.vector_store %arg3[%c0_7, %c0_8], %19 {strides = array<i32>} : memref<2x2xf32, #tpu.memory_space<vmem>>, vector<2x2xf32>,
    return
  }
}

</mosaic_0001>

<bundles_post_ra>
// kernel: tpu_custom_call.1
= control target key start
LH: loop header
LB: loop body
LE: loop exit
PB: predicated region body
PF: predicated region fallthrough
CT: control target
= control target key end

     0   :  { %8 = vsyncpa [#allocation3], 0  ;;  %s180_s0 = inlined_call_operand.hbm [shape: f32[2,2], index: 0, kind: input, shape index: {}]   ;;  %s181_s1 = inlined_call_operand.vmem [shape: f32[2,2], index: 1, kind: input, shape index: {}]   ;;  %s182_s2 = inlined_call_operand.vmem [shape: f32[2,2], index: 2, kind: input, shape index: {}]   ;;  %s183_s3 = inlined_call_operand.hbm [shape: f32[2,2], index: 3, kind: output, shape index: {}]  }
   0x1   :  { %9 = vsyncpa [#allocation4], 0  ;;  %s125_s12 = smov [#allocation2]   ;;  %s77_s16 = scalar_lea.hbm %s180_s0, 32 }
   0x2   :  { %s16_s13 = sshll.u32 %s125_s12, 4  ;;  %p78_p0 = scmp.ne.s32.totalorder %s180_s0, %s77_s16  ;;  %s17_s13 = int_to_ptr.vmem [resolvable:$true] %s16_s13 }
   0x3   :  { %p81_p1 = scmp.lt.u32.totalorder %s77_s16, %s180_s0 }
   0x5   :  { %p83_p2 = pnand %p81_p1, %p78_p0 }
   0x7   :  { %86 = shalt.err (!%p83_p2)
}
   0x8   :  { %s87_s21 = scalar_lea.vmem %s17_s13, 32  ;;  %p92_p4 = scmp.lt.s32.totalorder %s17_s13, %s17_s13 }
   0x9   :  { %p88_p3 = scmp.ne.s32.totalorder %s17_s13, %s87_s21  ;;  %p93_p5 = scmp.lt.s32.totalorder %s87_s21, %s87_s21 }
   0xb   :  { %p94_p6 = por %p93_p5, %p92_p4 }
   0xd   :  { %p95_p7 = pnand %p94_p6, %p88_p3 }
   0xf   :  { %98 = shalt.err (!%p95_p7)
}
  0x10   :  { %19 = dma.hbm_to_vmem [thread:$0]  %s180_s0, 32, %s17_s13, [#allocation3]  }
  0x11   :  { %121 = dma.done.wait [#allocation3], 32  }
  0x12   :  { %122 = vsyncadd [#allocation3], 4294967264  ;;  %v126_v0 = vmov 0   ;;  %v27_v1 = vld [vmem:[#allocation2] sm:$0x3]  ;;  %v127_v3 = vmov 0.0   ;;  %v38_v7 = vlaneseq }
  0x13   :  { %75 = vset.pattern.permute.xlu0 %v126_v0  ;;  %v29_v2 = vld [vmem:[%s182_s2] sm:$0x3]  ;;  %v128_v6 = vmov 1   ;;  %s129_s2 = smov [#allocation5]   ;;  %vm53_vm1 = vcmask 9216  }
  0x14   :  { %vm30_vm0 = vcmp.ge.f32.partialorder %v29_v2, 0.1  ;;  %v39_v8 = vshrl.u32 %v38_v7, 7  ;;  %v28_v11 = vld [vmem:[%s181_s1] sm:$0x3]  ;;  %s61_s27 = sshll.u32 %s129_s2, 4  ;;  %s62_s27 = int_to_ptr.vmem [resolvable:$true] %s61_s27 }
  0x15   :  { %v31_v4 = vsel %vm30_vm0, 1.1111112, %v127_v3  ;;  %s99_s28 = scalar_lea.vmem %s62_s27, 32  ;;  %p104_p9 = scmp.lt.s32.totalorder %s62_s27, %s62_s27 }
  0x16   :  { %v32_v5 = vmul.f32 %v31_v4, %v27_v1  ;;  %v40_v9 = vsub.s32 0, %v39_v8  ;;  %v49_v10 = vsub.s32 1, %v39_v8  ;;  %p100_p8 = scmp.ne.s32.totalorder %s62_s27, %s99_s28  ;;  %p105_p10 = scmp.lt.s32.totalorder %s99_s28, %s99_s28 }
  0x18   :  { %35 = vperm.xlu0 %75, %v32_v5   ;;  %v41_v13 = vrot.slane %v28_v11, %v40_v9  ;;  %v50_v14 = vrot.slane %v28_v11, %v49_v10  ;;  %p106_p11 = por %p105_p10, %p104_p9 }
  0x1a   :  { %p107_p12 = pnand %p106_p11, %p100_p8 }
  0x1c   :  { %76 = vset.pattern.permute.xlu0 %v128_v6 }
  0x1d   :  { %44 = vperm.xlu0 %76, %v32_v5  }
  0x97   :  { %v36_v12 = vpop.permute.xlu0 %35 }
  0x98   :  { %v42_v16 = vmul.f32 %v41_v13, %v36_v12 }
  0x9c   :  { %v45_v15 = vpop.permute.xlu0 %44 }
  0x9d   :  { %v51_v17 = vmul.f32 %v50_v14, %v45_v15 }
  0x9f   :  { %v52_v18 = vadd.f32 %v51_v17, %v42_v16 }
  0xa1   :  { %54 = vst.msk [vmem:[#allocation5] sm:$0x3] %vm53_vm1, %v52_v18 }
  0xa2   :  { %110 = shalt.err (!%p107_p12)
}
  0xa3   :  { %s111_s30 = scalar_lea.hbm %s183_s3, 32 }
  0xa4   :  { %p112_p13 = scmp.ne.s32.totalorder %s183_s3, %s111_s30  ;;  %p115_p0 = scmp.lt.u32.totalorder %s111_s30, %s183_s3 }
  0xa6   :  { %p117_p1 = pnand %p115_p0, %p112_p13 }
  0xa8   :  { %120 = shalt.err (!%p117_p1)
}
  0xa9   :  { %64 = dma.vmem_to_hbm [thread:$0]  %s62_s27, 32, %s183_s3, [#allocation4]  }
  0xaa   :  { %123 = dma.done.wait [#allocation4], 32  }
  0xab   :  { %124 = vsyncadd [#allocation4], 4294967264 }
  0xac   :  { %68 = vsyncpa [#allocation3], 1 }
  0xad   :  { %69 = vsyncpa [#allocation4], 1 }

</bundles_post_ra>
